<compile_context>
chip_gen: v5e
topology: v5e:2x2
jax: 0.10.0
libtpu: 0.0.40
codegen_flags: <defaults>
</compile_context>

<pallas_src>
import jax
import jax.numpy as jnp
from jax import lax
from jax.experimental import pallas as pl
from jax.experimental.pallas import tpu as pltpu


# ---------------------------------------------------------------------------
# Fused DenseBlock (num_layers == 1) Pallas kernel
# ---------------------------------------------------------------------------
def _dense_block_fused(x_nchw, p):
    N, Cin, H, W = x_nchw.shape
    HW = H * W
    Cmid = p["w1_mat"].shape[0]
    G = p["w2_taps"].shape[1]
    Cout = 2 * Cin + G
    L = (H + 2) * W          # flattened spatial length incl. one zero halo row above/below

    # Column-edge masks (f32, applied before the bf16 cast):
    #   row 0 zeroes image column W-1 (feeds the dw=0 taps),
    #   row 1 zeroes image column 0   (feeds the dw=2 taps).
    col = jnp.arange(HW, dtype=jnp.int32) % W
    edge_masks = jnp.stack([(col != W - 1).astype(jnp.float32),
                            (col != 0).astype(jnp.float32)], axis=0)      # (2, HW)

    x_flat = x_nchw.reshape(N, Cin, HW)

    def kernel(x_ref, s1_ref, b1_ref, w1_ref, s2_ref, b2_ref, w2_ref, m_ref,
               o_ref, im2col_ref):
        # x_ref      : (1, Cin, HW)  f32     input tile (channels on sublanes)
        # s*/b*      : (C, 1)        f32     folded BatchNorm scale / shift
        # w1_ref     : (Cmid, Cin)   bf16    1x1 conv weight
        # w2_ref     : (3, G, 3*Cmid)bf16    3x3 conv rows, [dh, g, dw*Cmid + c]
        # m_ref      : (2, HW)       f32     column-edge masks
        # o_ref      : (1, Cout, HW) f32     fused output [x, x, conv_out]
        # im2col_ref : (3*Cmid, L)   bf16    three dw-shifted, H-padded copies of `t`
        x = x_ref[0]                                              # (Cin, HW) f32

        # BN1 -> ReLU -> 1x1 conv (MXU, lanes = spatial)
        h = jnp.maximum(x * s1_ref[...] + b1_ref[...], 0.0)
        mid = jnp.dot(w1_ref[...], h.astype(jnp.bfloat16),
                      preferred_element_type=jnp.float32)         # (Cmid, HW) f32

        # BN2 -> ReLU (f32; v5e has no bf16 VPU), then the three dw variants in bf16
        t = jnp.maximum(mid * s2_ref[...] + b2_ref[...], 0.0)
        t_mid = t.astype(jnp.bfloat16)                            # dw = 1 taps
        t_l = (t * m_ref[0:1, :]).astype(jnp.bfloat16)            # dw = 0 taps (col W-1 -> 0)
        t_r = (t * m_ref[1:2, :]).astype(jnp.bfloat16)            # dw = 2 taps (col 0   -> 0)

        # Zero only the 1-row top/bottom halo strips (2*(W+1) lanes), every step, so the
        # kernel stays correct no matter how the "parallel" batch axis is partitioned.
        zeros_strip = jnp.zeros((3 * Cmid, W + 1), jnp.bfloat16)
        im2col_ref[:, 0:W + 1] = zeros_strip
        im2col_ref[:, HW + W - 1:L] = zeros_strip

        # Write the three column-shifted interiors.  Block dw lives at lane offset
        # W + 1 - dw, so the window for kernel row dh is the single contiguous slice
        # im2col_ref[:, dh*W : dh*W + HW] covering all three dw taps at once.
        im2col_ref[0 * Cmid:1 * Cmid, W + 1:W + 1 + HW] = t_l
        im2col_ref[1 * Cmid:2 * Cmid, W:W + HW] = t_mid
        im2col_ref[2 * Cmid:3 * Cmid, W - 1:W - 1 + HW] = t_r

        # 3x3 conv (pad=1) as 3 matmuls, each contracting K = 3*Cmid, f32 accumulation.
        acc = jnp.zeros((G, HW), jnp.float32)
        for dh in range(3):
            win = im2col_ref[:, dh * W:dh * W + HW]               # (3*Cmid, HW) bf16
            acc = acc + jnp.dot(w2_ref[dh], win,
                                preferred_element_type=jnp.float32)

        # Fused channel concat: DenseBlock output = [x, x, conv_out] (lane-dense stores).
        o_ref[0, 0:Cin, :] = x
        o_ref[0, Cin:2 * Cin, :] = x
        o_ref[0, 2 * Cin:Cout, :] = acc.astype(o_ref.dtype)

    out_flat = pl.pallas_call(
        kernel,
        out_shape=jax.ShapeDtypeStruct((N, Cout, HW), x_nchw.dtype),
        grid_spec=pltpu.PrefetchScalarGridSpec(
            num_scalar_prefetch=0,
            grid=(N,),
            in_specs=[
                pl.BlockSpec((1, Cin, HW), lambda n: (n, 0, 0)),
                pl.BlockSpec((Cin, 1), lambda n: (0, 0)),
                pl.BlockSpec((Cin, 1), lambda n: (0, 0)),
                pl.BlockSpec((Cmid, Cin), lambda n: (0, 0)),
                pl.BlockSpec((Cmid, 1), lambda n: (0, 0)),
                pl.BlockSpec((Cmid, 1), lambda n: (0, 0)),
                pl.BlockSpec((3, G, 3 * Cmid), lambda n: (0, 0, 0)),
                pl.BlockSpec((2, HW), lambda n: (0, 0)),
            ],
            out_specs=pl.BlockSpec((1, Cout, HW), lambda n: (n, 0, 0)),
            scratch_shapes=[pltpu.VMEM((3 * Cmid, L), jnp.bfloat16)],
        ),
        compiler_params=pltpu.CompilerParams(
            dimension_semantics=("parallel",)),   # batch-parallel; uses both v7x TCs
    )(x_flat, p["s1"], p["b1"], p["w1_mat"], p["s2"], p["b2"], p["w2_taps"],
      edge_masks)

    return out_flat.reshape(N, Cout, H, W)


@jax.jit
def dense_block_pallas(x_nchw, layer_params):
    # Mirrors `denselayer(*features)` in the reference: only num_layers == 1 is legal,
    # so the whole block (DenseUnit + both concats) is one fused kernel call.
    assert len(layer_params) == 1, "reference DenseBlock.forward only supports num_layers == 1"
    return _dense_block_fused(x_nchw, layer_params[0])


# ---------------------------------------------------------------------------
# Deterministic parameter construction (synthetic, from PRNGKey)
# ---------------------------------------------------------------------------
def make_dense_unit_params(key, in_channels, growth_rate, bn_size=4, eps=1e-5):
    mid = growth_rate * bn_size
    ks = jax.random.split(key, 10)

    def n(k, shape, scale=1.0):
        return scale * jax.random.normal(k, shape, dtype=jnp.float32)

    gamma1 = 1.0 + 0.1 * n(ks[0], (in_channels,))
    beta1 = 0.1 * n(ks[1], (in_channels,))
    mean1 = 0.1 * n(ks[2], (in_channels,))
    var1 = jnp.abs(n(ks[3], (in_channels,))) + 0.5
    w1 = n(ks[4], (mid, in_channels, 1, 1), scale=1.0 / (in_channels ** 0.5))      # OIHW
    gamma2 = 1.0 + 0.1 * n(ks[5], (mid,))
    beta2 = 0.1 * n(ks[6], (mid,))
    mean2 = 0.1 * n(ks[7], (mid,))
    var2 = jnp.abs(n(ks[8], (mid,))) + 0.5
    w2 = n(ks[9], (growth_rate, mid, 3, 3), scale=1.0 / ((9 * mid) ** 0.5))        # OIHW

    s1 = gamma1 / jnp.sqrt(var1 + eps)
    b1 = beta1 - mean1 * s1
    s2 = gamma2 / jnp.sqrt(var2 + eps)
    b2 = beta2 - mean2 * s2
    return {
        # kernel-format params (channels on sublanes; bf16 matmul weights)
        "s1": s1.reshape(-1, 1), "b1": b1.reshape(-1, 1),
        "w1_mat": w1[:, :, 0, 0].astype(jnp.bfloat16),                          # (Cmid, Cin)
        "s2": s2.reshape(-1, 1), "b2": b2.reshape(-1, 1),
        # (3, G, 3*Cmid): index [dh, g, dw*Cmid + c] == w2_oihw[g, c, dh, dw]
        "w2_taps": jnp.transpose(w2, (2, 0, 3, 1))
                      .reshape(3, growth_rate, 3 * mid).astype(jnp.bfloat16),
        # PyTorch-format f32 conv weights for the pure-JAX reference
        "w1_oihw": w1, "w2_oihw": w2,
    }


# ---------------------------------------------------------------------------
# Pure-JAX reference (eval-mode semantics) for validation
# ---------------------------------------------------------------------------
def _dense_unit_ref(x_nchw, p):
    s1 = p["s1"].reshape(1, -1, 1, 1)
    b1 = p["b1"].reshape(1, -1, 1, 1)
    s2 = p["s2"].reshape(1, -1, 1, 1)
    b2 = p["b2"].reshape(1, -1, 1, 1)
    h = jnp.maximum(x_nchw * s1 + b1, 0.0)
    h = lax.conv_general_dilated(h, p["w1_oihw"], (1, 1), "VALID",
                                 dimension_numbers=("NCHW", "OIHW", "NCHW"))
    h = jnp.maximum(h * s2 + b2, 0.0)
    out = lax.conv_general_dilated(h, p["w2_oihw"], (1, 1), ((1, 1), (1, 1)),
                                   dimension_numbers=("NCHW", "OIHW", "NCHW"))
    return jnp.concatenate([x_nchw, out], axis=1)


def dense_block_ref(x_nchw, layer_params):
    features = [x_nchw]
    for p in layer_params:
        assert len(features) == 1
        features.append(_dense_unit_ref(features[0], p))
    return jnp.concatenate(features, axis=1)


# ---------------------------------------------------------------------------
if __name__ == "__main__":
    key = jax.random.PRNGKey(0)
    kx, kp = jax.random.split(key)

    N, Cin, H, W = 2, 8, 16, 16
    growth_rate, bn_size, num_layers = 8, 4, 1   # num_layers must be 1 (see note above)

    x = jax.random.normal(kx, (N, Cin, H, W), dtype=jnp.float32)

    layer_params = []
    num_channels = Cin
    pkeys = jax.random.split(kp, num_layers)
    for i in range(num_layers):
        num_channels = num_channels + i * growth_rate
        layer_params.append(
            make_dense_unit_params(pkeys[i], num_channels, growth_rate, bn_size))

    out = dense_block_pallas(x, layer_params)
    out = jax.block_until_ready(out)

    ref = dense_block_ref(x, layer_params)

    assert out.shape == (N, 2 * Cin + growth_rate, H, W), out.shape
    max_err = float(jnp.max(jnp.abs(out - ref)))
    assert jnp.allclose(out, ref, rtol=2e-2, atol=2e-2), f"max abs err = {max_err}"

    print("KERNEL_OK")
</pallas_src>

<mosaic_0001>
module attributes {stable_mosaic.version = 11 : i64} {
  func.func @kernel(%arg0: i32, %arg1: memref<1x8x256xf32, #tpu.memory_space<vmem>>, %arg2: memref<8x1xf32, #tpu.memory_space<vmem>>, %arg3: memref<8x1xf32, #tpu.memory_space<vmem>>, %arg4: memref<32x8xbf16, #tpu.memory_space<vmem>>, %arg5: memref<32x1xf32, #tpu.memory_space<vmem>>, %arg6: memref<32x1xf32, #tpu.memory_space<vmem>>, %arg7: memref<3x8x96xbf16, #tpu.memory_space<vmem>>, %arg8: memref<2x256xf32, #tpu.memory_space<vmem>>, %arg9: memref<1x24x256xf32, #tpu.memory_space<vmem>>, %arg10: memref<96x288xbf16, #tpu.memory_space<vmem>>) attributes {dimension_semantics = [#tpu.dimension_semantics<parallel>], iteration_bounds = array<i64: 2>, scalar_prefetch = 0 : i64, scratch_operands = 1 : i64, tpu.core_type = #tpu.core_type<tc>, window_params = [{transform_indices = @transform_0, window_bounds = array<i64: 1, 8, 256>}, {pipeline_mode = #tpu.pipeline_mode<synchronous>, transform_indices = @transform_1, window_bounds = array<i64: 8, 1>}, {pipeline_mode = #tpu.pipeline_mode<synchronous>, transform_indices = @transform_2, window_bounds = array<i64: 8, 1>}, {pipeline_mode = #tpu.pipeline_mode<synchronous>, transform_indices = @transform_3, window_bounds = array<i64: 32, 8>}, {pipeline_mode = #tpu.pipeline_mode<synchronous>, transform_indices = @transform_4, window_bounds = array<i64: 32, 1>}, {pipeline_mode = #tpu.pipeline_mode<synchronous>, transform_indices = @transform_5, window_bounds = array<i64: 32, 1>}, {pipeline_mode = #tpu.pipeline_mode<synchronous>, transform_indices = @transform_6, window_bounds = array<i64: 3, 8, 96>}, {pipeline_mode = #tpu.pipeline_mode<synchronous>, transform_indices = @transform_7, window_bounds = array<i64: 2, 256>}, {transform_indices = @transform_8, window_bounds = array<i64: 1, 24, 256>}]} {
    %c0 = arith.constant 0 : index
    %c0_0 = arith.constant 0 : index
    %c0_1 = arith.constant 0 : index
    %0 = vector.load %arg1[%c0, %c0_0, %c0_1] : memref<1x8x256xf32, #tpu.memory_space<vmem>>, vector<1x8x256xf32>
    %1 = vector.shape_cast %0 : vector<1x8x256xf32> to vector<8x256xf32>
    %c0_2 = arith.constant 0 : index
    %c0_3 = arith.constant 0 : index
    %2 = vector.load %arg2[%c0_2, %c0_3] : memref<8x1xf32, #tpu.memory_space<vmem>>, vector<8x1xf32>
    %3 = vector.broadcast %2 : vector<8x1xf32> to vector<8x256xf32>
    %4 = arith.mulf %1, %3 : vector<8x256xf32>
    %c0_4 = arith.constant 0 : index
    %c0_5 = arith.constant 0 : index
    %5 = vector.load %arg3[%c0_4, %c0_5] : memref<8x1xf32, #tpu.memory_space<vmem>>, vector<8x1xf32>
    %6 = vector.broadcast %5 : vector<8x1xf32> to vector<8x256xf32>
    %7 = arith.addf %4, %6 : vector<8x256xf32>
    %cst = arith.constant 0.000000e+00 : f32
    %8 = vector.broadcast %cst : f32 to vector<8x256xf32>
    %9 = arith.maximumf %7, %8 : vector<8x256xf32>
    %c0_6 = arith.constant 0 : index
    %c0_7 = arith.constant 0 : index
    %10 = vector.load %arg4[%c0_6, %c0_7] : memref<32x8xbf16, #tpu.memory_space<vmem>>, vector<32x8xbf16>
    %11 = arith.truncf %9 : vector<8x256xf32> to vector<8x256xbf16>
    %cst_8 = arith.constant dense<0.000000e+00> : vector<32x256xf32>
    %12 = tpu.matmul %10, %11, %cst_8 {dimension_numbers = #tpu.dot_dimension_numbers<[1], [0], [0], [1], [0, 0, 1, 1], [], []>} : vector<32x8xbf16>, vector<8x256xbf16>, vector<32x256xf32> -> vector<32x256xf32>
    %c0_9 = arith.constant 0 : index
    %c0_10 = arith.constant 0 : index
    %13 = vector.load %arg5[%c0_9, %c0_10] : memref<32x1xf32, #tpu.memory_space<vmem>>, vector<32x1xf32>
    %14 = vector.broadcast %13 : vector<32x1xf32> to vector<32x256xf32>
    %15 = arith.mulf %12, %14 : vector<32x256xf32>
    %c0_11 = arith.constant 0 : index
    %c0_12 = arith.constant 0 : index
    %16 = vector.load %arg6[%c0_11, %c0_12] : memref<32x1xf32, #tpu.memory_space<vmem>>, vector<32x1xf32>
    %17 = vector.broadcast %16 : vector<32x1xf32> to vector<32x256xf32>
    %18 = arith.addf %15, %17 : vector<32x256xf32>
    %cst_13 = arith.constant 0.000000e+00 : f32
    %19 = vector.broadcast %cst_13 : f32 to vector<32x256xf32>
    %20 = arith.maximumf %18, %19 : vector<32x256xf32>
    %21 = arith.truncf %20 : vector<32x256xf32> to vector<32x256xbf16>
    %c0_14 = arith.constant 0 : index
    %c0_15 = arith.constant 0 : index
    %22 = vector.load %arg8[%c0_14, %c0_15] : memref<2x256xf32, #tpu.memory_space<vmem>>, vector<1x256xf32>
    %23 = vector.broadcast %22 : vector<1x256xf32> to vector<32x256xf32>
    %24 = arith.mulf %20, %23 : vector<32x256xf32>
    %25 = arith.truncf %24 : vector<32x256xf32> to vector<32x256xbf16>
    %c1 = arith.constant 1 : index
    %c0_16 = arith.constant 0 : index
    %26 = vector.load %arg8[%c1, %c0_16] : memref<2x256xf32, #tpu.memory_space<vmem>>, vector<1x256xf32>
    %27 = vector.broadcast %26 : vector<1x256xf32> to vector<32x256xf32>
    %28 = arith.mulf %20, %27 : vector<32x256xf32>
    %29 = arith.truncf %28 : vector<32x256xf32> to vector<32x256xbf16>
    %cst_17 = arith.constant 0.000000e+00 : bf16
    %30 = vector.broadcast %cst_17 : bf16 to vector<96x17xbf16>
    %c0_18 = arith.constant 0 : index
    %c0_19 = arith.constant 0 : index
    %31 = vector.load %arg10[%c0_18, %c0_19] : memref<96x288xbf16, #tpu.memory_space<vmem>>, vector<96x17xbf16>
    tpu.vector_store %arg10[%c0_18, %c0_19], %30 {strides = array<i32>} : memref<96x288xbf16, #tpu.memory_space<vmem>>, vector<96x17xbf16>,
    %c0_20 = arith.constant 0 : index
    %c271 = arith.constant 271 : index
    %32 = vector.load %arg10[%c0_20, %c271] : memref<96x288xbf16, #tpu.memory_space<vmem>>, vector<96x17xbf16>
    tpu.vector_store %arg10[%c0_20, %c271], %30 {strides = array<i32>} : memref<96x288xbf16, #tpu.memory_space<vmem>>, vector<96x17xbf16>,
    %c0_21 = arith.constant 0 : index
    %c17 = arith.constant 17 : index
    %33 = vector.load %arg10[%c0_21, %c17] : memref<96x288xbf16, #tpu.memory_space<vmem>>, vector<32x256xbf16>
    tpu.vector_store %arg10[%c0_21, %c17], %25 {strides = array<i32>} : memref<96x288xbf16, #tpu.memory_space<vmem>>, vector<32x256xbf16>,
    %c32 = arith.constant 32 : index
    %c16 = arith.constant 16 : index
    %34 = vector.load %arg10[%c32, %c16] : memref<96x288xbf16, #tpu.memory_space<vmem>>, vector<32x256xbf16>
    tpu.vector_store %arg10[%c32, %c16], %21 {strides = array<i32>} : memref<96x288xbf16, #tpu.memory_space<vmem>>, vector<32x256xbf16>,
    %c64 = arith.constant 64 : index
    %c15 = arith.constant 15 : index
    %35 = vector.load %arg10[%c64, %c15] : memref<96x288xbf16, #tpu.memory_space<vmem>>, vector<32x256xbf16>
    tpu.vector_store %arg10[%c64, %c15], %29 {strides = array<i32>} : memref<96x288xbf16, #tpu.memory_space<vmem>>, vector<32x256xbf16>,
    %cst_22 = arith.constant 0.000000e+00 : f32
    %36 = vector.broadcast %cst_22 : f32 to vector<8x256xf32>
    %c0_23 = arith.constant 0 : index
    %c0_24 = arith.constant 0 : index
    %37 = vector.load %arg10[%c0_23, %c0_24] : memref<96x288xbf16, #tpu.memory_space<vmem>>, vector<96x256xbf16>
    %c0_25 = arith.constant 0 : index
    %c0_26 = arith.constant 0 : index
    %c0_27 = arith.constant 0 : index
    %38 = vector.load %arg7[%c0_25, %c0_26, %c0_27] : memref<3x8x96xbf16, #tpu.memory_space<vmem>>, vector<1x8x96xbf16>
    %39 = vector.shape_cast %38 : vector<1x8x96xbf16> to vector<8x96xbf16>
    %cst_28 = arith.constant dense<0.000000e+00> : vector<8x256xf32>
    %40 = tpu.matmul %39, %37, %cst_28 {dimension_numbers = #tpu.dot_dimension_numbers<[1], [0], [0], [1], [0, 0, 1, 1], [], []>} : vector<8x96xbf16>, vector<96x256xbf16>, vector<8x256xf32> -> vector<8x256xf32>
    %41 = arith.addf %36, %40 : vector<8x256xf32>
    %c0_29 = arith.constant 0 : index
    %c16_30 = arith.constant 16 : index
    %42 = vector.load %arg10[%c0_29, %c16_30] : memref<96x288xbf16, #tpu.memory_space<vmem>>, vector<96x256xbf16>
    %c1_31 = arith.constant 1 : index
    %c0_32 = arith.constant 0 : index
    %c0_33 = arith.constant 0 : index
    %43 = vector.load %arg7[%c1_31, %c0_32, %c0_33] : memref<3x8x96xbf16, #tpu.memory_space<vmem>>, vector<1x8x96xbf16>
    %44 = vector.shape_cast %43 : vector<1x8x96xbf16> to vector<8x96xbf16>
    %cst_34 = arith.constant dense<0.000000e+00> : vector<8x256xf32>
    %45 = tpu.matmul %44, %42, %cst_34 {dimension_numbers = #tpu.dot_dimension_numbers<[1], [0], [0], [1], [0, 0, 1, 1], [], []>} : vector<8x96xbf16>, vector<96x256xbf16>, vector<8x256xf32> -> vector<8x256xf32>
    %46 = arith.addf %41, %45 : vector<8x256xf32>
    %c0_35 = arith.constant 0 : index
    %c32_36 = arith.constant 32 : index
    %47 = vector.load %arg10[%c0_35, %c32_36] : memref<96x288xbf16, #tpu.memory_space<vmem>>, vector<96x256xbf16>
    %c2 = arith.constant 2 : index
    %c0_37 = arith.constant 0 : index
    %c0_38 = arith.constant 0 : index
    %48 = vector.load %arg7[%c2, %c0_37, %c0_38] : memref<3x8x96xbf16, #tpu.memory_space<vmem>>, vector<1x8x96xbf16>
    %49 = vector.shape_cast %48 : vector<1x8x96xbf16> to vector<8x96xbf16>
    %cst_39 = arith.constant dense<0.000000e+00> : vector<8x256xf32>
    %50 = tpu.matmul %49, %47, %cst_39 {dimension_numbers = #tpu.dot_dimension_numbers<[1], [0], [0], [1], [0, 0, 1, 1], [], []>} : vector<8x96xbf16>, vector<96x256xbf16>, vector<8x256xf32> -> vector<8x256xf32>
    %51 = arith.addf %46, %50 : vector<8x256xf32>
    %c0_40 = arith.constant 0 : index
    %c0_41 = arith.constant 0 : index
    %c0_42 = arith.constant 0 : index
    %52 = vector.load %arg9[%c0_40, %c0_41, %c0_42] : memref<1x24x256xf32, #tpu.memory_space<vmem>>, vector<1x8x256xf32>
    %53 = vector.shape_cast %52 : vector<1x8x256xf32> to vector<8x256xf32>
    %54 = vector.shape_cast %1 : vector<8x256xf32> to vector<1x8x256xf32>
    tpu.vector_store %arg9[%c0_40, %c0_41, %c0_42], %54 {strides = array<i32>} : memref<1x24x256xf32, #tpu.memory_space<vmem>>, vector<1x8x256xf32>,
    %c0_43 = arith.constant 0 : index
    %c8 = arith.constant 8 : index
    %c0_44 = arith.constant 0 : index
    %55 = vector.load %arg9[%c0_43, %c8, %c0_44] : memref<1x24x256xf32, #tpu.memory_space<vmem>>, vector<1x8x256xf32>
    %56 = vector.shape_cast %55 : vector<1x8x256xf32> to vector<8x256xf32>
    %57 = vector.shape_cast %1 : vector<8x256xf32> to vector<1x8x256xf32>
    tpu.vector_store %arg9[%c0_43, %c8, %c0_44], %57 {strides = array<i32>} : memref<1x24x256xf32, #tpu.memory_space<vmem>>, vector<1x8x256xf32>,
    %c0_45 = arith.constant 0 : index
    %c16_46 = arith.constant 16 : index
    %c0_47 = arith.constant 0 : index
    %58 = vector.load %arg9[%c0_45, %c16_46, %c0_47] : memref<1x24x256xf32, #tpu.memory_space<vmem>>, vector<1x8x256xf32>
    %59 = vector.shape_cast %58 : vector<1x8x256xf32> to vector<8x256xf32>
    %60 = vector.shape_cast %51 : vector<8x256xf32> to vector<1x8x256xf32>
    tpu.vector_store %arg9[%c0_45, %c16_46, %c0_47], %60 {strides = array<i32>} : memref<1x24x256xf32, #tpu.memory_space<vmem>>, vector<1x8x256xf32>,
    return
  }
  func.func @transform_0(%arg0: i32) -> (i32, i32, i32) {
    %c0_i32 = arith.constant 0 : i32
    %c0_i32_0 = arith.constant 0 : i32
    %c0_i32_1 = arith.constant 0 : i32
    return %arg0, %c0_i32, %c0_i32_0 : i32, i32, i32
  }
  func.func @transform_1(%arg0: i32) -> (i32, i32) {
    %c0_i32 = arith.constant 0 : i32
    %c0_i32_0 = arith.constant 0 : i32
    %c0_i32_1 = arith.constant 0 : i32
    return %c0_i32, %c0_i32_0 : i32, i32
  }
  func.func @transform_2(%arg0: i32) -> (i32, i32) {
    %c0_i32 = arith.constant 0 : i32
    %c0_i32_0 = arith.constant 0 : i32
    %c0_i32_1 = arith.constant 0 : i32
    return %c0_i32, %c0_i32_0 : i32, i32
  }
  func.func @transform_3(%arg0: i32) -> (i32, i32) {
    %c0_i32 = arith.constant 0 : i32
    %c0_i32_0 = arith.constant 0 : i32
    %c0_i32_1 = arith.constant 0 : i32
    return %c0_i32, %c0_i32_0 : i32, i32
  }
  func.func @transform_4(%arg0: i32) -> (i32, i32) {
    %c0_i32 = arith.constant 0 : i32
    %c0_i32_0 = arith.constant 0 : i32
    %c0_i32_1 = arith.constant 0 : i32
    return %c0_i32, %c0_i32_0 : i32, i32
  }
  func.func @transform_5(%arg0: i32) -> (i32, i32) {
    %c0_i32 = arith.constant 0 : i32
    %c0_i32_0 = arith.constant 0 : i32
    %c0_i32_1 = arith.constant 0 : i32
    return %c0_i32, %c0_i32_0 : i32, i32
  }
  func.func @transform_6(%arg0: i32) -> (i32, i32, i32) {
    %c0_i32 = arith.constant 0 : i32
    %c0_i32_0 = arith.constant 0 : i32
    %c0_i32_1 = arith.constant 0 : i32
    %c0_i32_2 = arith.constant 0 : i32
    return %c0_i32, %c0_i32_0, %c0_i32_1 : i32, i32, i32
  }
  func.func @transform_7(%arg0: i32) -> (i32, i32) {
    %c0_i32 = arith.constant 0 : i32
    %c0_i32_0 = arith.constant 0 : i32
    %c0_i32_1 = arith.constant 0 : i32
    return %c0_i32, %c0_i32_0 : i32, i32
  }
  func.func @transform_8(%arg0: i32) -> (i32, i32, i32) {
    %c0_i32 = arith.constant 0 : i32
    %c0_i32_0 = arith.constant 0 : i32
    %c0_i32_1 = arith.constant 0 : i32
    return %arg0, %c0_i32, %c0_i32_0 : i32, i32, i32
  }
}

</mosaic_0001>

<bundles_post_ra>
// kernel: dense_block_pallas.1
= control target key start
LH: loop header
LB: loop body
LE: loop exit
PB: predicated region body
PF: predicated region fallthrough
CT: control target
= control target key end

     0   :  { %s1247_s27 = smov 0   ;;  %s1587_s0 = inlined_call_operand.vmem [shape: f32[2,8,256], index: 0, kind: input, shape index: {}]   ;;  %s1588_s1 = inlined_call_operand.vmem [shape: f32[8,1], index: 1, kind: input, shape index: {}]   ;;  %s1589_s2 = inlined_call_operand.vmem [shape: f32[8,1], index: 2, kind: input, shape index: {}]   ;;  %s1590_s3 = inlined_call_operand.vmem [shape: bf16[32,8], index: 3, kind: input, shape index: {}]   ;;  %s1591_s4 = inlined_call_operand.vmem [shape: f32[32,1], index: 4, kind: input, shape index: {}]   ;;  %s1592_s5 = inlined_call_operand.vmem [shape: f32[32,1], index: 5, kind: input, shape index: {}]   ;;  %s1593_s6 = inlined_call_operand.vmem [shape: bf16[3,8,96], index: 6, kind: input, shape index: {}]   ;;  %s1594_s7 = inlined_call_operand.vmem [shape: f32[2,256], index: 7, kind: input, shape index: {}]   ;;  %s1595_s8 = inlined_call_operand.vmem [shape: f32[2,24,256], index: 8, kind: output, shape index: {}]  }
   0x1 LB: > { %s1046_s28 = sadd.s32 4294967295, %s1194_s27   ;;  %p1050_p0 = scmp.ge.s32.totalorder %s1194_s27, 1  ;;  %s1194_s27 = sphi %s1247_s27, %s18_s27  }
   0x2   : > { %p262_p1 = scmp.lt.s32.totalorder %s1194_s27, 3 }
   0x4   : > { %p263_p2 = pnand %p1050_p0, %p262_p1 }
   0x5   : > { %p296_p3 = scmp.lt.s32.totalorder (!%p263_p2), %s1046_s28, 1  ;;  %s1197_s23 = smov (!%p263_p2), 16  }
   0x6   : > { %266 = sbr.rel (%p263_p2) target bundleno = 762 (0x2fa), region = 52  ;;  %s1198_s24 = smov (!%p263_p2), 15  }
   0x7   : > { %s1199_s25 = smov (!%p263_p2), 17   ;;  %s1200_s26 = smov (!%p263_p2), 112  }
   0xb   : > { %v309_v0 = vld [vmem:[%s1588_s1] sm:$0xff]  ;;  %v1196_v1 = vmov 0   ;;  %v428_v4 = vld [vmem:[%s1592_s5 + $0x8] sm:$0xff]  ;;  %s1603_s28 = smov (!%p296_p3, %s1046_s28), 1  ;;  %v397_v7 = vld [vmem:[%s1591_s4 + $0x10] sm:$0xff]  ;;  %vm350_vm0 = vcmask 1043456  }
   0xc   : > { %1185 = vset.pattern.permute.xlu0 %v1196_v1  ;;  %1186 = vset.pattern.permute.xlu1 %v1196_v1  ;;  %v317_v2 = vld [vmem:[%s1589_s2] sm:$0xff]  ;;  %s1149_s15 = sshll.u32 %s1603_s28, 4  ;;  %s1170_s16 = smul.u32 48, %s1603_s28  ;;  %v398_v8 = vld [vmem:[%s1591_s4 + $0x18] sm:$0xff]  ;;  %v396_v9 = vld [vmem:[%s1591_s4 + $0x8] sm:$0xff]  ;;  %vm343_vm1 = vcmask 64512  }
   0xd   : > { %312 = vperm.xlu0 %1185, %v309_v0   ;;  %1187 = vset.pattern.permute.xlu2 %v1196_v1  ;;  %v395_v3 = vld [vmem:[%s1591_s4] sm:$0xff]  ;;  %s300_s19 = scalar_lea.vmem %s1587_s0, %s1149_s15  ;;  %v429_v10 = vld [vmem:[%s1592_s5 + $0x10] sm:$0xff]  ;;  %v430_v11 = vld [vmem:[%s1592_s5 + $0x18] sm:$0xff]  ;;  %vm508_vm2 = vcmask 134144   ;;  %vm521_vm3 = vcmask 257144   ;;  %vm563_vm4 = vcmask 1043592  }
   0xe   : > { %s1276_s22 = scalar_lea.vmem %s1595_s8, %s1170_s16  ;;  %v307_v5 = vld [vmem:[%s300_s19] sm:$0xff]  ;;  %v308_v6 = vld [vmem:[%s300_s19 + $0x8] sm:$0xff]  ;;  %411 = vperm.xlu1 %1186, %v397_v7   ;;  %443 = vperm.xlu2 %1187, %v429_v10   ;;  %509 = vst.msk [vmem:[#allocation2] sm:$0xf] %vm508_vm2, %v1196_v1  ;;  %vm564_vm5 = vcmask 1047556   ;;  %vm550_vm6 = vcmask 138240  }
   0xf   : > { %985 = vst [vmem:[%s1276_s22] sm:$0xff] %v307_v5  ;;  %v427_v13 = vld [vmem:[%s1592_s5] sm:$0xff]  ;;  %v1151_v26 = vld [vmem:[%s1590_s3 + $0x8] sm:$0xff]  ;;  %vm1413_vm7 = vmor %vm564_vm5, %vm563_vm4  ;;  %vm603_vm8 = vcmask 1043584   ;;  %vm590_vm9 = vcmask 130048   ;;  %vm606_vm10 = vcmask 125952   ;;  %vm643_vm12 = vcmask 1043576  }
  0x10   : > { %986 = vst [vmem:[%s1276_s22 + $0x8] sm:$0xff] %v308_v6  ;;  %v1150_v25 = vld [vmem:[%s1590_s3] sm:$0xff]  ;;  %vm1422_vm11 = vmor %vm564_vm5, %vm603_vm8  ;;  %vm630_vm13 = vcmask 121856   ;;  %vm646_vm14 = vcmask 117760   ;;  %s1201_s28 = smov 96  }
  0x11   : > { %987 = vst [vmem:[%s1276_s22 + $0x10] sm:$0xff] %v307_v5  ;;  %v1066_v32 = vld [vmem:[%s1594_s7 + $0x1] ss:$2 sm:$0x3]  ;;  %vm1437_vm15 = vmor %vm564_vm5, %vm643_vm12 }
  0x12   : > { %988 = vst [vmem:[%s1276_s22 + $0x18] sm:$0xff] %v308_v6  ;;  %v471_v35 = vld [vmem:[%s1594_s7] ss:$2 sm:$0x3]  ;;  %v1320_v39 = vperm.slane %v1066_v32, 0  ;;  %v1322_v42 = vperm.slane %v1066_v32, 1 }
  0x13   : > { %v1324_v43 = vperm.slane %v471_v35, 0  ;;  %v1326_v44 = vperm.slane %v471_v35, 1  ;;  %522 = vst.msk [vmem:[#allocation2 + $0x8] sm:$0xf] %vm521_vm3, %v1196_v1 }
  0x14   : > { %510 = vst.msk [vmem:[#allocation2 + $0xc] sm:$0xf] %vm508_vm2, %v1196_v1 }
  0x15   : > { %320 = vperm.xlu0 %1185, %v317_v2   ;;  %511 = vst.msk [vmem:[#allocation2 + $0x18] sm:$0xf] %vm508_vm2, %v1196_v1 }
  0x16   : > { %416 = vperm.xlu1 %1186, %v398_v8   ;;  %448 = vperm.xlu2 %1187, %v430_v11   ;;  %512 = vst.msk [vmem:[#allocation2 + $0x24] sm:$0xf] %vm508_vm2, %v1196_v1 }
  0x17   : > { %513 = vst.msk [vmem:[#allocation2 + $0x30] sm:$0xf] %vm508_vm2, %v1196_v1 }
  0x18   : > { %514 = vst.msk [vmem:[#allocation2 + $0x3c] sm:$0xf] %vm508_vm2, %v1196_v1 }
  0x19   : > { %515 = vst.msk [vmem:[#allocation2 + $0x48] sm:$0xf] %vm508_vm2, %v1196_v1 }
  0x1a   : > { %516 = vst.msk [vmem:[#allocation2 + $0x54] sm:$0xf] %vm508_vm2, %v1196_v1 }
  0x1b   : > { %517 = vst.msk [vmem:[#allocation2 + $0x60] sm:$0xf] %vm508_vm2, %v1196_v1 }
  0x1c   : > { %518 = vst.msk [vmem:[#allocation2 + $0x6c] sm:$0xf] %vm508_vm2, %v1196_v1 }
  0x1d   : > { %401 = vperm.xlu0 %1185, %v395_v3   ;;  %519 = vst.msk [vmem:[#allocation2 + $0x78] sm:$0xf] %vm508_vm2, %v1196_v1 }
  0x1e   : > { %406 = vperm.xlu1 %1186, %v396_v9   ;;  %433 = vperm.xlu2 %1187, %v427_v13   ;;  %520 = vst.msk [vmem:[#allocation2 + $0x84] sm:$0xf] %vm508_vm2, %v1196_v1 }
  0x1f   : > { %523 = vst.msk [vmem:[#allocation2 + $0x14] sm:$0xf] %vm521_vm3, %v1196_v1 }
  0x20   : > { %524 = vst.msk [vmem:[#allocation2 + $0x20] sm:$0xf] %vm521_vm3, %v1196_v1 }
  0x21   : > { %525 = vst.msk [vmem:[#allocation2 + $0x2c] sm:$0xf] %vm521_vm3, %v1196_v1 }
  0x22   : > { %526 = vst.msk [vmem:[#allocation2 + $0x38] sm:$0xf] %vm521_vm3, %v1196_v1 }
  0x23   : > { %527 = vst.msk [vmem:[#allocation2 + $0x44] sm:$0xf] %vm521_vm3, %v1196_v1 }
  0x24   : > { %528 = vst.msk [vmem:[#allocation2 + $0x50] sm:$0xf] %vm521_vm3, %v1196_v1 }
  0x25   : > { %438 = vperm.xlu0 %1185, %v428_v4   ;;  %529 = vst.msk [vmem:[#allocation2 + $0x5c] sm:$0xf] %vm521_vm3, %v1196_v1 }
  0x26   : > { %530 = vst.msk [vmem:[#allocation2 + $0x68] sm:$0xf] %vm521_vm3, %v1196_v1 }
  0x27   : > { %531 = vst.msk [vmem:[#allocation2 + $0x74] sm:$0xf] %vm521_vm3, %v1196_v1 }
  0x28   : > { %532 = vst.msk [vmem:[#allocation2 + $0x80] sm:$0xf] %vm521_vm3, %v1196_v1 }
  0x29   : > { %533 = vst.msk [vmem:[#allocation2 + $0x8c] sm:$0xf] %vm521_vm3, %v1196_v1 }
  0x68   : > { %v1306_v27 = vpop.permute.xlu2 %443 }
  0x70   : > { %v1310_v29 = vpop.permute.xlu2 %448 }
  0x78   : > { %v434_v38 = vpop.permute.xlu2 %433 }
  0x7f   : > { %v313_v12 = vpop.permute.xlu0 %312 }
  0x80   : > { %v315_v14 = vmul.f32 %v313_v12, %v307_v5  ;;  %v316_v15 = vmul.f32 %v313_v12, %v308_v6  ;;  %v1308_v28 = vpop.permute.xlu1 %411 }
  0x87   : > { %v321_v16 = vpop.permute.xlu0 %320 }
  0x88   : > { %v323_v17 = vadd.f32 %v321_v16, %v315_v14  ;;  %v324_v18 = vadd.f32 %v321_v16, %v316_v15  ;;  %v1312_v30 = vpop.permute.xlu1 %416 }
  0x8a   : > { %v325_v19 = vmax.f32 %v323_v17, 0.0  ;;  %v326_v20 = vmax.f32 %v324_v18, 0.0 }
  0x8c   : > { %v331_v21 = vpack.c.bf16 %v325_v19, %v325_v19  ;;  %v332_v22 = vpack.c.bf16 %v326_v20, %v326_v20 }
  0x8e   : > { %v352_v23 = vsel %vm350_vm0, %v331_v21, 0  ;;  %v355_v24 = vsel %vm350_vm0, %v332_v22, 0  ;;  %vm795_vm0 = vcmask 916480  }
  0x8f   : > { %364 = vmatpush.bf16.msra.mxu0 %v352_v23  ;;  %383 = vmatpush.bf16.msra.mxu1 %v355_v24  ;;  %v402_v31 = vpop.permute.xlu0 %401 }
  0x90   : > { %v407_v47 = vpop.permute.xlu1 %406 }
  0x92   : > { %1062 = vmatmul.msk.bf16.vlgmr.msra.gmra.mxu0 %vm343_vm1, %v1150_v25  ;;  %1064 = vmatmul.msk.bf16.vlgmr.msra.gmra.mxu1 %vm343_vm1, %v1150_v25 }
  0x97   : > { %v439_v58 = vpop.permute.xlu0 %438 }
  0xa2   : > { %1063 = vmatmul.msk.bf16.gmra.mxu0 %vm343_vm1, %v1151_v26  ;;  %1065 = vmatmul.msk.bf16.gmra.mxu1 %vm343_vm1, %v1151_v26  ;;  %vm820_vm1 = vcmask 785408  }
 0x10f   : > { %v366_v33 = vpop.f32.mrf.mxu0  ;;  %v385_v34 = vpop.f32.mrf.mxu1 }
 0x110   : > { %v419_v36 = vmul.f32 %v402_v31, %v366_v33  ;;  %v420_v37 = vmul.f32 %v402_v31, %v385_v34 }
 0x112   : > { %v451_v40 = vadd.f32 %v434_v38, %v419_v36  ;;  %v452_v41 = vadd.f32 %v434_v38, %v420_v37 }
 0x114   : > { %v459_v45 = vmax.f32 %v451_v40, 0.0  ;;  %v460_v46 = vmax.f32 %v452_v41, 0.0 }
 0x116   : > { %v467_v48 = vpack.c.bf16 %v460_v46, %v459_v45  ;;  %v496_v49 = vmul.f32 %v1320_v39, %v459_v45  ;;  %v497_v50 = vmul.f32 %v1322_v42, %v460_v46  ;;  %v477_v51 = vmul.f32 %v1324_v43, %v459_v45 }
 0x117   : > { %v368_v52 = vpop.f32.mrf.mxu0  ;;  %v387_v53 = vpop.f32.mrf.mxu1  ;;  %v478_v54 = vmul.f32 %v1326_v44, %v460_v46 }
 0x118   : > { %v421_v55 = vmul.f32 %v407_v47, %v368_v52  ;;  %v422_v56 = vmul.f32 %v407_v47, %v387_v53  ;;  %578 = vrot.lane.b32.xlu1 %v467_v48, %s1197_s23  ;;  %v504_v57 = vpack.c.bf16 %v497_v50, %v496_v49 }
 0x119   : > { %v485_v59 = vpack.c.bf16 %v478_v54, %v477_v51 }
 0x11a   : > { %v453_v60 = vadd.f32 %v439_v58, %v421_v55  ;;  %v454_v61 = vadd.f32 %v439_v58, %v422_v56  ;;  %618 = vrot.lane.b32.xlu0 %v504_v57, %s1198_s24 }
 0x11b   : > { %538 = vrot.lane.b32.xlu2 %v485_v59, %s1199_s25 }
 0x11c   : > { %v461_v62 = vmax.f32 %v453_v60, 0.0  ;;  %v462_v63 = vmax.f32 %v454_v61, 0.0 }
 0x11e   : > { %v498_v0 = vmul.f32 %v1320_v39, %v461_v62  ;;  %v499_v2 = vmul.f32 %v1322_v42, %v462_v63  ;;  %v479_v3 = vmul.f32 %v1324_v43, %v461_v62  ;;  %v480_v4 = vmul.f32 %v1326_v44, %v462_v63 }
 0x11f   : > { %v371_v5 = vpop.f32.mrf.mxu0  ;;  %v390_v6 = vpop.f32.mrf.mxu1  ;;  %v468_v11 = vpack.c.bf16 %v462_v63, %v461_v62 }
 0x120   : > { %v423_v7 = vmul.f32 %v1308_v28, %v371_v5  ;;  %v424_v8 = vmul.f32 %v1308_v28, %v390_v6  ;;  %v505_v9 = vpack.c.bf16 %v499_v2, %v498_v0  ;;  %v486_v10 = vpack.c.bf16 %v480_v4, %v479_v3 }
 0x122   : > { %v455_v12 = vadd.f32 %v1306_v27, %v423_v7  ;;  %v456_v13 = vadd.f32 %v1306_v27, %v424_v8  ;;  %620 = vrot.lane.b32.xlu1 %v505_v9, %s1198_s24  ;;  %540 = vrot.lane.b32.xlu0 %v486_v10, %s1199_s25 }
 0x123   : > { %580 = vrot.lane.b32.xlu2 %v468_v11, %s1197_s23 }
 0x124   : > { %v463_v14 = vmax.f32 %v455_v12, 0.0  ;;  %v464_v15 = vmax.f32 %v456_v13, 0.0 }
 0x126   : > { %v500_v16 = vmul.f32 %v1320_v39, %v463_v14  ;;  %v501_v17 = vmul.f32 %v1322_v42, %v464_v15  ;;  %v481_v18 = vmul.f32 %v1324_v43, %v463_v14  ;;  %v482_v19 = vmul.f32 %v1326_v44, %v464_v15 }
 0x127   : > { %v373_v20 = vpop.f32.mrf.mxu0  ;;  %v392_v21 = vpop.f32.mrf.mxu1  ;;  %v469_v26 = vpack.c.bf16 %v464_v15, %v463_v14 }
 0x128   : > { %v425_v22 = vmul.f32 %v1312_v30, %v373_v20  ;;  %v426_v23 = vmul.f32 %v1312_v30, %v392_v21  ;;  %v506_v24 = vpack.c.bf16 %v501_v17, %v500_v16  ;;  %v487_v25 = vpack.c.bf16 %v482_v19, %v481_v18 }
 0x12a   : > { %v457_v27 = vadd.f32 %v1310_v29, %v425_v22  ;;  %v458_v28 = vadd.f32 %v1310_v29, %v426_v23  ;;  %622 = vrot.lane.b32.xlu1 %v506_v24, %s1198_s24  ;;  %542 = vrot.lane.b32.xlu0 %v487_v25, %s1199_s25 }
 0x12b   : > { %582 = vrot.lane.b32.xlu2 %v469_v26, %s1197_s23 }
 0x12c   : > { %v465_v30 = vmax.f32 %v457_v27, 0.0  ;;  %v466_v31 = vmax.f32 %v458_v28, 0.0 }
 0x12e   : > { %v502_v32 = vmul.f32 %v1320_v39, %v465_v30  ;;  %v503_v33 = vmul.f32 %v1322_v42, %v466_v31  ;;  %v483_v29 = vmul.f32 %v1324_v43, %v465_v30  ;;  %v484_v34 = vmul.f32 %v1326_v44, %v466_v31 }
 0x12f   : > { %v470_v37 = vpack.c.bf16 %v466_v31, %v465_v30 }
 0x130   : > { %v507_v35 = vpack.c.bf16 %v503_v33, %v502_v32  ;;  %v488_v36 = vpack.c.bf16 %v484_v34, %v483_v29 }
 0x132   : > { %544 = vrot.lane.b32.xlu1 %v488_v36, %s1199_s25  ;;  %584 = vrot.lane.b32.xlu0 %v470_v37, %s1197_s23 }
 0x133   : > { %624 = vrot.lane.b32.xlu2 %v507_v35, %s1198_s24 }
 0x175   : > { %v539_v1 = vpop.permute.xlu2 %538 }
 0x176   : > { %v546_v39 = vrot.slane %v539_v1, 4 }
 0x178   : > { %v551_v40 = vsel %vm550_vm6, %v546_v39, %v539_v1  ;;  %567 = vst.msk [vmem:[#allocation2 + $0x8] sm:$0xf] %vm508_vm2, %v546_v39 }
 0x179   : > { %566 = vst.msk [vmem:[#allocation2] sm:$0xff] %vm1413_vm7, %v551_v40 }
 0x17d   : > { %v581_v41 = vpop.permute.xlu2 %580 }
 0x17e   : > { %v587_v43 = vrot.slane %v581_v41, 4 }
 0x17f   : > { %v1078_v27 = vld [vmem:[#allocation2 + $0x8] sm:$0xf] }
 0x180   : > { %v592_v44 = vsel %vm590_vm9, %v587_v43, %v581_v41  ;;  %609 = vst.msk [vmem:[#allocation2 + $0x44] sm:$0xf] %vm606_vm10, %v587_v43  ;;  %v1152_v32 = vld [vmem:[#allocation2 + $0x4] sm:$0xf] }
 0x181   : > { %608 = vst.msk [vmem:[#allocation2 + $0x3c] sm:$0xff] %vm1422_vm11, %v592_v44 }
 0x185   : > { %v583_v45 = vpop.permute.xlu2 %582 }
 0x186   : > { %v588_v46 = vrot.slane %v583_v45, 4 }
 0x187   : > { %v1166_v58 = vld [vmem:[#allocation2 + $0x40] sm:$0xf0] }
 0x188   : > { %v593_v47 = vsel %vm590_vm9, %v588_v46, %v583_v45  ;;  %611 = vst.msk [vmem:[#allocation2 + $0x50] sm:$0xf] %vm606_vm10, %v588_v46  ;;  %v1096_v62 = vld [vmem:[#allocation2 + $0x3c] sm:$0xf0]  ;;  %v1157_v63 = vld [vmem:[#allocation2 + $0x38] sm:$0xf0] }
 0x189   : > { %610 = vst.msk [vmem:[#allocation2 + $0x48] sm:$0xff] %vm1422_vm11, %v593_v47  ;;  %v1070_v45 = vld [vmem:[#allocation2] sm:$0xf] }
 0x18a   : > { %v579_v48 = vpop.permute.xlu1 %578 }
 0x18b   : > { %v586_v49 = vrot.slane %v579_v48, 4 }
 0x18c   : > { %v619_v50 = vpop.permute.xlu0 %618 }
 0x18d   : > { %v591_v51 = vsel %vm590_vm9, %v586_v49, %v579_v48  ;;  %607 = vst.msk [vmem:[#allocation2 + $0x38] sm:$0xf] %vm606_vm10, %v586_v49  ;;  %v626_v53 = vrot.slane %v619_v50, 4  ;;  %v625_v54 = vpop.permute.xlu2 %624 }
 0x18e   : > { %605 = vst.msk [vmem:[#allocation2 + $0x30] sm:$0xff] %vm1422_vm11, %v591_v51  ;;  %v629_v55 = vrot.slane %v625_v54, 4 }
 0x18f   : > { %v631_v56 = vsel %vm630_vm13, %v626_v53, %v619_v50  ;;  %647 = vst.msk [vmem:[#allocation2 + $0x68] sm:$0xf] %vm646_vm14, %v626_v53  ;;  %v1114_v52 = vld [vmem:[#allocation2 + $0x50] sm:$0xf] }
 0x190   : > { %645 = vst.msk [vmem:[#allocation2 + $0x60] sm:$0xff] %vm1437_vm15, %v631_v56  ;;  %v634_v57 = vsel %vm630_vm13, %v629_v55, %v625_v54  ;;  %v1106_v38 = vld [vmem:[#allocation2 + $0x48] sm:$0xf]  ;;  %v1158_v47 = vld [vmem:[#allocation2 + $0x4c] sm:$0xf] }
 0x191   : > { %652 = vst.msk [vmem:[#allocation2 + $0x84] sm:$0xff] %vm1437_vm15, %v634_v57 }
 0x192   : > { %653 = vst.msk [vmem:[#allocation2 + $0x8c] sm:$0xf] %vm646_vm14, %v629_v55 }
 0x194   : > { %v621_v59 = vpop.permute.xlu1 %620  ;;  %v541_v60 = vpop.permute.xlu0 %540  ;;  %v1102_v61 = vld [vmem:[#allocation2 + $0x38] sm:$0xf] }
 0x195   : > { %v627_v0 = vrot.slane %v621_v59, 4  ;;  %v547_v2 = vrot.slane %v541_v60, 4  ;;  %v1451_v3 = vor.u32 %v1166_v58, %v1102_v61  ;;  %v1156_v4 = vld [vmem:[#allocation2 + $0x34] sm:$0xf]  ;;  %v1094_v5 = vld [vmem:[#allocation2 + $0x30] sm:$0xf] }
 0x196   : > { %v1453_v6 = vor.u32 %v1156_v4, %v1096_v62  ;;  %v1455_v7 = vor.u32 %v1157_v63, %v1094_v5  ;;  %v1126_v14 = vld [vmem:[#allocation2 + $0x68] sm:$0xf] }
 0x197   : > { %v632_v8 = vsel %vm630_vm13, %v627_v0, %v621_v59  ;;  %649 = vst.msk [vmem:[#allocation2 + $0x74] sm:$0xf] %vm646_vm14, %v627_v0  ;;  %v552_v9 = vsel %vm550_vm6, %v547_v2, %v541_v60  ;;  %775 = vrot.lane.b32.xlu0 %v1451_v3, %s1200_s26  ;;  %v1160_v16 = vld [vmem:[#allocation2 + $0x64] sm:$0xf]  ;;  %v1118_v17 = vld [vmem:[#allocation2 + $0x60] sm:$0xf] }
 0x198   : > { %648 = vst.msk [vmem:[#allocation2 + $0x6c] sm:$0xff] %vm1437_vm15, %v632_v8  ;;  %773 = vrot.lane.b32.xlu2 %v1453_v6, %s1200_s26  ;;  %771 = vrot.lane.b32.xlu1 %v1455_v7, %s1200_s26  ;;  %v1163_v29 = vld [vmem:[#allocation2 + $0x80] sm:$0xf0]  ;;  %v1132_v34 = vld [vmem:[#allocation2 + $0x84] sm:$0xf0] }
 0x199   : > { %568 = vst.msk [vmem:[#allocation2 + $0xc] sm:$0xff] %vm1413_vm7, %v552_v9  ;;  %v1169_v61 = vld [vmem:[#allocation2 + $0x88] sm:$0xf0] }
 0x19a   : > { %569 = vst.msk [vmem:[#allocation2 + $0x14] sm:$0xf] %vm508_vm2, %v547_v2 }
 0x19c   : > { %v623_v10 = vpop.permute.xlu1 %622  ;;  %v543_v11 = vpop.permute.xlu0 %542 }
 0x19d   : > { %v628_v12 = vrot.slane %v623_v10, 4  ;;  %v548_v13 = vrot.slane %v543_v11, 4 }
 0x19e   : > { %v1168_v15 = vld [vmem:[#allocation2 + $0x70] sm:$0xf0] }
 0x19f   : > { %v633_v18 = vsel %vm630_vm13, %v628_v12, %v623_v10  ;;  %651 = vst.msk [vmem:[#allocation2 + $0x80] sm:$0xf] %vm646_vm14, %v628_v12  ;;  %v553_v19 = vsel %vm550_vm6, %v548_v13, %v543_v11  ;;  %v1127_v20 = vor.u32 %v1168_v15, %v1126_v14  ;;  %v1120_v21 = vld [vmem:[#allocation2 + $0x6c] sm:$0xf0]  ;;  %v1161_v22 = vld [vmem:[#allocation2 + $0x68] sm:$0xf0] }
 0x1a0   : > { %650 = vst.msk [vmem:[#allocation2 + $0x78] sm:$0xff] %vm1437_vm15, %v633_v18  ;;  %v1123_v23 = vor.u32 %v1160_v16, %v1120_v21  ;;  %v1119_v24 = vor.u32 %v1161_v22, %v1118_v17  ;;  %v1072_v33 = vld [vmem:[#allocation2 + $0xc] sm:$0xf0]  ;;  %v1153_v35 = vld [vmem:[#allocation2 + $0x8] sm:$0xf0] }
 0x1a1   : > { %570 = vst.msk [vmem:[#allocation2 + $0x18] sm:$0xff] %vm1413_vm7, %v553_v19  ;;  %787 = vrot.lane.b32.xlu0 %v1127_v20, %s1200_s26  ;;  %v1164_v28 = vld [vmem:[#allocation2 + $0x10] sm:$0xf0]  ;;  %v1489_v41 = vor.u32 %v1152_v32, %v1072_v33  ;;  %v1495_v46 = vor.u32 %v1153_v35, %v1070_v45  ;;  %v1067_v45 = vld [vmem:[%s1593_s6 + $0x4] sm:$0xf] }
 0x1a2   : > { %571 = vst.msk [vmem:[#allocation2 + $0x20] sm:$0xf] %vm508_vm2, %v548_v13  ;;  %785 = vrot.lane.b32.xlu2 %v1123_v23, %s1200_s26  ;;  %783 = vrot.lane.b32.xlu1 %v1119_v24, %s1200_s26  ;;  %v1485_v1 = vor.u32 %v1164_v28, %v1078_v27  ;;  %v666_v28 = vld [vmem:[%s1593_s6] sm:$0xf] }
 0x1a4   : > { %v545_v25 = vpop.permute.xlu1 %544  ;;  %v585_v26 = vpop.permute.xlu0 %584 }
 0x1a5   : > { %v549_v30 = vrot.slane %v545_v25, 4  ;;  %v589_v31 = vrot.slane %v585_v26, 4 }
 0x1a6   : > { %v1138_v60 = vld [vmem:[#allocation2 + $0x80] sm:$0xf] }
 0x1a7   : > { %v554_v36 = vsel %vm550_vm6, %v549_v30, %v545_v25  ;;  %573 = vst.msk [vmem:[#allocation2 + $0x2c] sm:$0xf] %vm508_vm2, %v549_v30  ;;  %v594_v37 = vsel %vm590_vm9, %v589_v31, %v585_v26  ;;  %v1130_v39 = vld [vmem:[#allocation2 + $0x78] sm:$0xf]  ;;  %v1162_v40 = vld [vmem:[#allocation2 + $0x7c] sm:$0xf]  ;;  %v1139_v62 = vor.u32 %v1169_v61, %v1138_v60 }
 0x1a8   : > { %572 = vst.msk [vmem:[#allocation2 + $0x24] sm:$0xff] %vm1413_vm7, %v554_v36  ;;  %v1131_v43 = vor.u32 %v1163_v29, %v1130_v39  ;;  %v1135_v44 = vor.u32 %v1162_v40, %v1132_v34  ;;  %v1082_v56 = vld [vmem:[#allocation2 + $0x18] sm:$0xf]  ;;  %v1154_v58 = vld [vmem:[#allocation2 + $0x1c] sm:$0xf] }
 0x1a9   : > { %612 = vst.msk [vmem:[#allocation2 + $0x54] sm:$0xff] %vm1422_vm11, %v594_v37  ;;  %763 = vrot.lane.b32.xlu0 %v1485_v1, %s1200_s26  ;;  %v1090_v0 = vld [vmem:[#allocation2 + $0x20] sm:$0xf] }
 0x1aa   : > { %613 = vst.msk [vmem:[#allocation2 + $0x5c] sm:$0xf] %vm606_vm10, %v589_v31  ;;  %761 = vrot.lane.b32.xlu2 %v1489_v41, %s1200_s26  ;;  %867 = vmatpush.bf16.msrb.mxu0 %v1131_v43 }
 0x1ab   : > { %880 = vmatpush.bf16.msrb.mxu1 %v1135_v44  ;;  %759 = vrot.lane.b32.xlu1 %v1495_v46, %s1200_s26 }
 0x1ae   : > { %868 = vmatpush.bf16.msrb.mxu0 %v1119_v24  ;;  %v1165_v63 = vld [vmem:[#allocation2 + $0x28] sm:$0xf0] }
 0x1af   : > { %881 = vmatpush.bf16.msrb.mxu1 %v1123_v23  ;;  %v1155_v53 = vld [vmem:[#allocation2 + $0x20] sm:$0xf0]  ;;  %v1084_v55 = vld [vmem:[#allocation2 + $0x24] sm:$0xf0]  ;;  %v1091_v2 = vor.u32 %v1165_v63, %v1090_v0 }
 0x1b0   : > { %v1159_v42 = vld [vmem:[#allocation2 + $0x50] sm:$0xf0]  ;;  %v1108_v48 = vld [vmem:[#allocation2 + $0x54] sm:$0xf0]  ;;  %v1083_v57 = vor.u32 %v1155_v53, %v1082_v56  ;;  %v1087_v59 = vor.u32 %v1154_v58, %v1084_v55  ;;  %v1144_v0 = vld [vmem:[%s1593_s6 + $0x8] sm:$0xf] }
 0x1b1   : > { %921 = vrot.lane.b32.xlu0 %v1127_v20, %s1201_s28  ;;  %v1107_v49 = vor.u32 %v1159_v42, %v1106_v38  ;;  %v1111_v50 = vor.u32 %v1158_v47, %v1108_v48  ;;  %v1167_v51 = vld [vmem:[#allocation2 + $0x58] sm:$0xf0] }
 0x1b2   : > { %919 = vrot.lane.b32.xlu2 %v1123_v23, %s1201_s28  ;;  %v1115_v54 = vor.u32 %v1167_v51, %v1114_v52 }
 0x1b3   : > { %917 = vrot.lane.b32.xlu1 %v1119_v24, %s1201_s28  ;;  %869 = vmatpush.bf16.msrb.mxu0 %v1107_v49 }
 0x1b4   : > { %882 = vmatpush.bf16.msrb.mxu1 %v1111_v50 }
 0x1b7   : > { %870 = vmatpush.bf16.msrb.mxu0 %v1455_v7 }
 0x1b8   : > { %883 = vmatpush.bf16.msrb.mxu1 %v1453_v6 }
 0x1b9   : > { %781 = vrot.lane.b32.xlu0 %v1115_v54, %s1200_s26 }
 0x1ba   : > { %779 = vrot.lane.b32.xlu2 %v1111_v50, %s1200_s26 }
 0x1bb   : > { %777 = vrot.lane.b32.xlu1 %v1107_v49, %s1200_s26  ;;  %871 = vmatpush.bf16.msrb.mxu0 %v1083_v57 }
 0x1bc   : > { %884 = vmatpush.bf16.msrb.mxu1 %v1087_v59 }
 0x1bf   : > { %872 = vmatpush.bf16.msrb.mxu0 %v1495_v46 }
 0x1c0   : > { %885 = vmatpush.bf16.msrb.mxu1 %v1489_v41 }
 0x1c1   : > { %915 = vrot.lane.b32.xlu0 %v1115_v54, %s1201_s28 }
 0x1c2   : > { %913 = vrot.lane.b32.xlu2 %v1111_v50, %s1201_s28  ;;  %1142 = vmatmul.msk.bf16.vlgmr.msrb.gmra.mxu0 %vm820_vm1, %v666_v28 }
 0x1c3   : > { %911 = vrot.lane.b32.xlu1 %v1107_v49, %s1201_s28  ;;  %1143 = vmatmul.msk.bf16.vlgmr.msrb.gmra.mxu1 %vm820_vm1, %v666_v28 }
 0x1c9   : > { %793 = vrot.lane.b32.xlu0 %v1139_v62, %s1200_s26 }
 0x1ca   : > { %791 = vrot.lane.b32.xlu2 %v1135_v44, %s1200_s26 }
 0x1cb   : > { %789 = vrot.lane.b32.xlu1 %v1131_v43, %s1200_s26 }
 0x1d1   : > { %769 = vrot.lane.b32.xlu0 %v1091_v2, %s1200_s26 }
 0x1d2   : > { %767 = vrot.lane.b32.xlu2 %v1087_v59, %s1200_s26 }
 0x1d3   : > { %765 = vrot.lane.b32.xlu1 %v1083_v57, %s1200_s26 }
 0x1d9   : > { %927 = vrot.lane.b32.xlu0 %v1139_v62, %s1201_s28 }
 0x1da   : > { %925 = vrot.lane.b32.xlu2 %v1135_v44, %s1201_s28 }
 0x1db   : > { %923 = vrot.lane.b32.xlu1 %v1131_v43, %s1201_s28 }
 0x1e1   : > { %909 = vrot.lane.b32.xlu0 %v1451_v3, %s1201_s28 }
 0x1e2   : > { %907 = vrot.lane.b32.xlu2 %v1453_v6, %s1201_s28 }
 0x1e3   : > { %905 = vrot.lane.b32.xlu1 %v1455_v7, %s1201_s28 }
 0x1e9   : > { %903 = vrot.lane.b32.xlu0 %v1091_v2, %s1201_s28 }
 0x1ea   : > { %901 = vrot.lane.b32.xlu2 %v1087_v59, %s1201_s28 }
 0x1eb   : > { %899 = vrot.lane.b32.xlu1 %v1083_v57, %s1201_s28 }
 0x1f1   : > { %897 = vrot.lane.b32.xlu0 %v1485_v1, %s1201_s28 }
 0x1f2   : > { %895 = vrot.lane.b32.xlu2 %v1489_v41, %s1201_s28  ;;  %v774_v3 = vpop.permute.xlu2 %773 }
 0x1f3   : > { %893 = vrot.lane.b32.xlu1 %v1495_v46, %s1201_s28 }
 0x1fc   : > { %v786_v4 = vpop.permute.xlu2 %785 }
 0x204   : > { %v762_v5 = vpop.permute.xlu2 %761 }
 0x209   : > { %v776_v6 = vpop.permute.xlu0 %775 }
 0x20a   : > { %v772_v7 = vpop.permute.xlu1 %771  ;;  %v801_v35 = vsel %vm795_vm0, %v774_v3, %v776_v6 }
 0x20b   : > { %v800_v36 = vsel %vm795_vm0, %v772_v7, %v774_v3 }
 0x20c   : > { %v1539_v8 = vpop.permute.xlu2 %919 }
 0x213   : > { %v788_v9 = vpop.permute.xlu0 %787 }
 0x214   : > { %v784_v10 = vpop.permute.xlu1 %783  ;;  %v780_v12 = vpop.permute.xlu2 %779  ;;  %v805_v27 = vsel %vm795_vm0, %v786_v4, %v788_v9 }
 0x215   : > { %v804_v30 = vsel %vm795_vm0, %v784_v10, %v786_v4 }
 0x21b   : > { %v764_v11 = vpop.permute.xlu0 %763 }
 0x21c   : > { %v914_v16 = vpop.permute.xlu2 %913  ;;  %v797_v43 = vsel %vm795_vm0, %v762_v5, %v764_v11 }
 0x21d   : > { %v760_v13 = vpop.permute.xlu1 %759 }
 0x21e   : > { %v796_v46 = vsel %vm795_vm0, %v760_v13, %v762_v5 }
 0x223   : > { %v922_v14 = vpop.permute.xlu0 %921 }
 0x224   : > { %v792_v19 = vpop.permute.xlu2 %791  ;;  %v939_v48 = vsel %vm820_vm1, %v1539_v8, %v922_v14 }
 0x225   : > { %v918_v15 = vpop.permute.xlu1 %917 }
 0x226   : > { %v938_v49 = vsel %vm820_vm1, %v918_v15, %v1539_v8 }
 0x22b   : > { %v782_v17 = vpop.permute.xlu0 %781 }
 0x22c   : > { %v768_v22 = vpop.permute.xlu2 %767  ;;  %v803_v32 = vsel %vm795_vm0, %v780_v12, %v782_v17 }
 0x22d   : > { %v778_v18 = vpop.permute.xlu1 %777 }
 0x22e   : > { %v802_v34 = vsel %vm795_vm0, %v778_v18, %v780_v12 }
 0x233   : > { %v916_v20 = vpop.permute.xlu0 %915 }
 0x234   : > { %v926_v33 = vpop.permute.xlu2 %925  ;;  %v937_v51 = vsel %vm820_vm1, %v914_v16, %v916_v20 }
 0x235   : > { %v912_v21 = vpop.permute.xlu1 %911 }
 0x236   : > { %v936_v52 = vsel %vm820_vm1, %v912_v21, %v914_v16 }
 0x23b   : > { %v794_v23 = vpop.permute.xlu0 %793 }
 0x23c   : > { %v807_v24 = vsel %vm795_vm0, %v792_v19, %v794_v23  ;;  %v908_v41 = vpop.permute.xlu2 %907 }
 0x23d   : > { %v790_v25 = vpop.permute.xlu1 %789  ;;  %839 = vmatpush.bf16.msra.mxu3 %v807_v24 }
 0x23e   : > { %v806_v26 = vsel %vm795_vm0, %v790_v25, %v792_v19 }
 0x23f   : > { %826 = vmatpush.bf16.msra.mxu2 %v806_v26  ;;  %v874_v2 = vpop.f32.mrf.mxu0 }
 0x240   : > { %v887_v3 = vpop.f32.mrf.mxu1 }
 0x241   : > { %840 = vmatpush.bf16.msra.mxu3 %v805_v27 }
 0x243   : > { %827 = vmatpush.bf16.msra.mxu2 %v804_v30  ;;  %v770_v31 = vpop.permute.xlu0 %769 }
 0x244   : > { %v799_v1 = vsel %vm795_vm0, %v768_v22, %v770_v31  ;;  %v902_v50 = vpop.permute.xlu2 %901 }
 0x245   : > { %v766_v29 = vpop.permute.xlu1 %765  ;;  %841 = vmatpush.bf16.msra.mxu3 %v803_v32 }
 0x246   : > { %v798_v40 = vsel %vm795_vm0, %v766_v29, %v768_v22 }
 0x247   : > { %828 = vmatpush.bf16.msra.mxu2 %v802_v34  ;;  %v876_v4 = vpop.f32.mrf.mxu0 }
 0x248   : > { %v889_v5 = vpop.f32.mrf.mxu1 }
 0x249   : > { %842 = vmatpush.bf16.msra.mxu3 %v801_v35 }
 0x24b   : > { %829 = vmatpush.bf16.msra.mxu2 %v800_v36  ;;  %v928_v37 = vpop.permute.xlu0 %927 }
 0x24c   : > { %v941_v44 = vsel %vm820_vm1, %v926_v33, %v928_v37  ;;  %v896_v58 = vpop.permute.xlu2 %895 }
 0x24d   : > { %v924_v39 = vpop.permute.xlu1 %923  ;;  %843 = vmatpush.bf16.msra.mxu3 %v799_v1 }
 0x24e   : > { %v940_v38 = vsel %vm820_vm1, %v924_v39, %v926_v33 }
 0x24f   : > { %830 = vmatpush.bf16.msra.mxu2 %v798_v40 }
 0x251   : > { %844 = vmatpush.bf16.msra.mxu3 %v797_v43 }
 0x253   : > { %831 = vmatpush.bf16.msra.mxu2 %v796_v46  ;;  %v910_v42 = vpop.permute.xlu0 %909 }
 0x254   : > { %1141 = vmatmul.msk.bf16.vlgmr.msra.gmra.mxu3 %vm820_vm1, %v1067_v45  ;;  %v935_v55 = vsel %vm820_vm1, %v908_v41, %v910_v42 }
 0x255   : > { %972 = vmatpush.bf16.msrb.mxu3 %v941_v44  ;;  %v906_v47 = vpop.permute.xlu1 %905 }
 0x256   : > { %1140 = vmatmul.msk.bf16.vlgmr.msra.gmra.mxu2 %vm820_vm1, %v1067_v45  ;;  %v934_v56 = vsel %vm820_vm1, %v906_v47, %v908_v41 }
 0x257   : > { %959 = vmatpush.bf16.msrb.mxu2 %v940_v38 }
 0x259   : > { %973 = vmatpush.bf16.msrb.mxu3 %v939_v48 }
 0x25b   : > { %960 = vmatpush.bf16.msrb.mxu2 %v938_v49  ;;  %v904_v53 = vpop.permute.xlu0 %903 }
 0x25c   : > { %v933_v57 = vsel %vm820_vm1, %v902_v50, %v904_v53 }
 0x25d   : > { %974 = vmatpush.bf16.msrb.mxu3 %v937_v51  ;;  %v900_v54 = vpop.permute.xlu1 %899 }
 0x25e   : > { %v932_v59 = vsel %vm820_vm1, %v900_v54, %v902_v50 }
 0x25f   : > { %961 = vmatpush.bf16.msrb.mxu2 %v936_v52 }
 0x261   : > { %975 = vmatpush.bf16.msrb.mxu3 %v935_v55 }
 0x263   : > { %962 = vmatpush.bf16.msrb.mxu2 %v934_v56  ;;  %v898_v60 = vpop.permute.xlu0 %897 }
 0x264   : > { %v931_v61 = vsel %vm820_vm1, %v896_v58, %v898_v60 }
 0x265   : > { %976 = vmatpush.bf16.msrb.mxu3 %v933_v57  ;;  %v894_v62 = vpop.permute.xlu1 %893 }
 0x266   : > { %v930_v63 = vsel %vm820_vm1, %v894_v62, %v896_v58 }
 0x267   : > { %963 = vmatpush.bf16.msrb.mxu2 %v932_v59 }
 0x269   : > { %977 = vmatpush.bf16.msrb.mxu3 %v931_v61 }
 0x26b   : > { %964 = vmatpush.bf16.msrb.mxu2 %v930_v63 }
 0x26c   : > { %1146 = vmatmul.msk.bf16.vlgmr.msrb.gmra.mxu3 %vm820_vm1, %v1144_v0 }
 0x26e   : > { %1145 = vmatmul.msk.bf16.vlgmr.msrb.gmra.mxu2 %vm820_vm1, %v1144_v0 }
 0x2d7   : > { %v846_v6 = vpop.f32.mrf.mxu3 }
 0x2d8   : > { %v888_v10 = vadd.f32 %v887_v3, %v846_v6 }
 0x2d9   : > { %v833_v7 = vpop.f32.mrf.mxu2 }
 0x2da   : > { %v875_v12 = vadd.f32 %v874_v2, %v833_v7 }
 0x2df   : > { %v848_v8 = vpop.f32.mrf.mxu3 }
 0x2e1   : > { %v835_v9 = vpop.f32.mrf.mxu2 }
 0x2ef   : > { %v979_v11 = vpop.f32.mrf.mxu3 }
 0x2f0   : > { %v984_v13 = vadd.f32 %v979_v11, %v888_v10 }
 0x2f1   : > { %v966_v14 = vpop.f32.mrf.mxu2 }
 0x2f2   : > { %990 = vst [vmem:[%s1276_s22 + $0x28] sm:$0xff] %v984_v13  ;;  %v983_v15 = vadd.f32 %v966_v14, %v875_v12 }
 0x2f4   : > { %989 = vst [vmem:[%s1276_s22 + $0x20] sm:$0xff] %v983_v15 }
 0x2f7   : > { %v981_v16 = vpop.f32.mrf.mxu3 }
 0x2f9   : > { %v968_v17 = vpop.f32.mrf.mxu2 }
 0x2fa PF: > { %s18_s27 = sadd.s32 1, %s1194_s27  }
 0x2fb   : > { %p15_p4 = scmp.ge.s32.totalorder %s18_s27, 4  }
 0x2fd   :  { %17 = sbr.rel (!%p15_p4) target bundleno = 1 (0x1), region = 85 }

</bundles_post_ra>
